<compile_context>
chip_gen: v7x
topology: tpu7x:2x2x1
jax: 0.10.0
libtpu: 0.0.40
codegen_flags: <defaults>
</compile_context>

<pallas_src>
import math

import jax
import jax.numpy as jnp
from jax import lax
from jax.experimental import pallas as pl
from jax.experimental.pallas import tpu as pltpu

L, D, K = 1024, 128, 1          # fixed by the module's __init__
_NEG_INF = -1e30


def _round_up(n, m):
    return ((n + m - 1) // m) * m


def _choose_tiling(n):
    """Pick the H tile height and scoped-VMEM limit.

    H is streamed as f32 (4 B/elem): a (tile_n, 1024) tile is 4*tile_n KiB,
    double-buffered, plus the f32 z/gated intermediates.  On 128-MiB-VMEM
    parts (v5e/v6e) we allow 2048 rows; on v7x (64 MiB physical, 32 MiB
    default scoped) we stay at 1024 rows and a 40 MiB scoped limit.
    """
    cap, limit = 2048, 64 * 1024 * 1024
    try:
        if pltpu.get_tpu_info().vmem_capacity_bytes < 100 * 1024 * 1024:
            cap, limit = 1024, 40 * 1024 * 1024
    except Exception:  # conservative fallback if the query is unavailable
        cap, limit = 1024, 40 * 1024 * 1024
    tile_n = min(_round_up(max(n, 1), 8), cap)
    return tile_n, limit


def gated_abmil_kernel(n_ref, bw_ref,
                       h_ref, wvu_ref, bvu_ref, ww_ref,
                       m_out_ref,
                       m_sc, l_sc, acc_sc):
    i = pl.program_id(0)
    tile_n = h_ref.shape[0]

    @pl.when(i == 0)
    def _init():
        m_sc[...] = jnp.full_like(m_sc, _NEG_INF)
        l_sc[...] = jnp.zeros_like(l_sc)
        acc_sc[...] = jnp.zeros_like(acc_sc)

    # Validity mask for the ragged tail (last tile may extend past N; the
    # out-of-bounds rows contain undefined data, so zero them before use).
    row = i * tile_n + lax.broadcasted_iota(jnp.int32, (tile_n, 1), 0)
    valid = row < n_ref[0]                                            # (T, 1)

    # Stream f32 H straight from HBM; cast (and zero invalid rows) in VMEM.
    h_bf = jnp.where(valid, h_ref[...], 0.0).astype(jnp.bfloat16)     # (T, L)

    # Fused gated-attention branches: one bf16 MXU pass through (L, 2D),
    # columns [:D] -> tanh branch, [D:] -> sigmoid branch (f32 accumulation).
    z = jnp.dot(h_bf, wvu_ref[...], preferred_element_type=jnp.float32) + bvu_ref[...]
    # TODO(synk): compute tanh/sigmoid in bf16 on v6e/v7x (2x EUP throughput);
    # keep f32 on v5e (no bf16 EUP/VPU).
    gated = jnp.tanh(z[:, :D]) * jax.nn.sigmoid(z[:, D:])             # (T, D) f32

    # K=1 attention score on the VPU/XLU (no lane-1 MXU matmul).
    s = jnp.sum(gated * ww_ref[...], axis=-1, keepdims=True) + bw_ref[0]   # (T, 1)
    s = jnp.where(valid, s, _NEG_INF)

    # Online softmax over instances, accumulated across H tiles.
    m_old = m_sc[...]                                                 # (1, 1)
    m_new = jnp.maximum(m_old, jnp.max(s, axis=0, keepdims=True))
    alpha = jnp.exp(m_old - m_new)
    p = jnp.where(valid, jnp.exp(s - m_new), 0.0)                     # (T, 1) f32
    l_sc[...] = alpha * l_sc[...] + jnp.sum(p, axis=0, keepdims=True)
    # M = A @ H as a (1,T)x(T,L) MXU contraction (f32 accumulation); the MXU
    # has slack here while the VPU path would bind on v7x.
    acc_sc[...] = alpha * acc_sc[...] + lax.dot_general(
        p.astype(jnp.bfloat16), h_bf,
        dimension_numbers=(((0,), (0,)), ((), ())),
        preferred_element_type=jnp.float32)                           # (1, L)
    m_sc[...] = m_new

    @pl.when(i == pl.num_programs(0) - 1)
    def _finalize():
        l = jnp.maximum(l_sc[...], 1e-30)        # guard empty-bag (n == 0)
        m_out_ref[...] = acc_sc[...] / l         # (1, L) == A @ H, lane-dense store


def init_params(key):
    """Deterministic PyTorch-nn.Linear-style init (uniform +-1/sqrt(fan_in))."""
    ks = jax.random.split(key, 8)

    def linear(kw, kb, fan_in, fan_out):
        bound = 1.0 / math.sqrt(fan_in)
        w = jax.random.uniform(kw, (fan_in, fan_out), jnp.float32, -bound, bound)
        b = jax.random.uniform(kb, (1, fan_out), jnp.float32, -bound, bound)
        return w, b

    wv, bv = linear(ks[0], ks[1], L, D)       # attention_V
    wu, bu = linear(ks[2], ks[3], L, D)       # attention_U
    ww, bw = linear(ks[4], ks[5], D, K)       # attention_weights
    wc, bc = linear(ks[6], ks[7], L * K, 2)   # classifier
    return dict(wv=wv, bv=bv, wu=wu, bu=bu, ww=ww, bw=bw, wc=wc, bc=bc)


def gated_abmil_forward(x, subtype_labels, adj, mask, params):
    # adj and mask are accepted but unused, matching the PyTorch forward.
    h = jnp.squeeze(x, axis=0)                                        # (N, L) f32
    n = h.shape[0]
    tile_n, vmem_limit = _choose_tiling(n)
    grid_n = pl.cdiv(n, tile_n)

    # Fuse V/U branch weights into one lane-dense (L, 2D) bf16 operand.
    # (In production this fusion/cast would be done once at parameter load.)
    wvu = jnp.concatenate([params["wv"], params["wu"]], axis=1).astype(jnp.bfloat16)
    bvu = jnp.concatenate([params["bv"], params["bu"]], axis=1)       # (1, 2D) f32
    ww_row = jnp.reshape(params["ww"], (1, D))                        # (1, D) f32
    bw = jnp.reshape(params["bw"], (1,)).astype(jnp.float32)          # SMEM scalar
    n_arr = jnp.array([n], dtype=jnp.int32)                           # SMEM scalar

    smem = pl.BlockSpec(memory_space=pltpu.MemorySpace.SMEM)
    # TODO(synk): mark the loop-invariant weight specs with
    # pipeline_mode=pl.Buffered(1) (or DMA them once into scratch) to free
    # their second VMEM buffer when pushing tile_n higher on v7x.
    m_bag = pl.pallas_call(
        gated_abmil_kernel,
        out_shape=jax.ShapeDtypeStruct((1, L), jnp.float32),
        grid=(grid_n,),
        in_specs=[
            smem,                                                     # n (valid rows)
            smem,                                                     # bw
            pl.BlockSpec((tile_n, L), lambda i: (i, 0)),              # H f32 tiles (pipelined)
            pl.BlockSpec((L, 2 * D), lambda i: (0, 0)),               # fused Wv|Wu (resident)
            pl.BlockSpec((1, 2 * D), lambda i: (0, 0)),               # fused bv|bu
            pl.BlockSpec((1, D), lambda i: (0, 0)),                   # Ww as a row
        ],
        out_specs=pl.BlockSpec((1, L), lambda i: (0, 0)),             # bag embedding M
        scratch_shapes=[
            pltpu.VMEM((1, 1), jnp.float32),                          # running max
            pltpu.VMEM((1, 1), jnp.float32),                          # running sum
            pltpu.VMEM((1, L), jnp.float32),                          # weighted-sum acc
        ],
        compiler_params=pltpu.CompilerParams(
            dimension_semantics=("arbitrary",),                       # reduction over N
            vmem_limit_bytes=vmem_limit,
        ),
    )(n_arr, bw, h, wvu, bvu, ww_row)

    # One-time classifier epilogue in plain JAX (tiny, keeps the kernel output
    # lane-dense and the resident VMEM accounting simple).
    logits = m_bag @ params["wc"] + params["bc"]                      # (1, 2)
    prob = jax.nn.sigmoid(logits)
    pred = jnp.argmax(prob, axis=1)
    # CrossEntropyLoss applied directly to the sigmoid outputs, exactly like
    # the PyTorch module does (log_softmax over the (1,2) "prob" tensor).
    logp = jax.nn.log_softmax(prob, axis=1)
    loss = -jnp.mean(jnp.take_along_axis(logp, subtype_labels[:, None], axis=1))
    return prob, pred, subtype_labels, loss
    # TODO(synk): for many-bag workloads add a leading "parallel" bag axis
    # (and/or split N across v7x's two TensorCores) instead of one pallas_call
    # per bag; bump the H BlockSpec to pl.Buffered(3) if xprof shows exposed
    # DMA at step boundaries.


def _reference_prob(x, params):
    """Pure-JAX f32 reference of the PyTorch forward (for a sanity check)."""
    h = jnp.squeeze(x, axis=0)
    a_v = jnp.tanh(h @ params["wv"] + params["bv"])
    a_u = jax.nn.sigmoid(h @ params["wu"] + params["bu"])
    a = (a_v * a_u) @ params["ww"] + params["bw"]                     # (N, 1)
    a = jax.nn.softmax(a.T, axis=1)                                   # (1, N)
    m = a @ h                                                         # (1, L)
    return jax.nn.sigmoid(m @ params["wc"] + params["bc"])            # (1, 2)


if __name__ == "__main__":
    key = jax.random.PRNGKey(0)
    kx, kp = jax.random.split(key)

    N = 16                                    # small bag size
    x = jax.random.normal(kx, (1, N, L), jnp.float32)   # (1, N, 1024), squeezed in forward
    subtype_labels = jnp.array([1], dtype=jnp.int32)
    adj = None   # unused by forward
    mask = None  # unused by forward

    params = init_params(kp)
    prob, pred, labels, loss = gated_abmil_forward(x, subtype_labels, adj, mask, params)
    jax.block_until_ready((prob, pred, loss))

    # Sanity check against the pure-JAX f32 reference (bf16 weight/activation
    # casts in the kernel => loose tolerance).
    prob_ref = _reference_prob(x, params)
    assert prob.shape == (1, 2) and bool(jnp.all(jnp.isfinite(prob)))
    assert jnp.allclose(prob, prob_ref, atol=2e-2, rtol=2e-2), (prob, prob_ref)

    print("KERNEL_OK")
</pallas_src>

<mosaic_0001>
module attributes {stable_mosaic.version = 11 : i64} {
  func.func @gated_abmil_kernel(%arg0: i32, %arg1: memref<1xi32, #tpu.memory_space<smem>>, %arg2: memref<1xf32, #tpu.memory_space<smem>>, %arg3: memref<16x1024xf32, #tpu.memory_space<vmem>>, %arg4: memref<1024x256xbf16, #tpu.memory_space<vmem>>, %arg5: memref<1x256xf32, #tpu.memory_space<vmem>>, %arg6: memref<1x128xf32, #tpu.memory_space<vmem>>, %arg7: memref<1x1024xf32, #tpu.memory_space<vmem>>, %arg8: memref<1x1xf32, #tpu.memory_space<vmem>>, %arg9: memref<1x1xf32, #tpu.memory_space<vmem>>, %arg10: memref<1x1024xf32, #tpu.memory_space<vmem>>) attributes {dimension_semantics = [#tpu.dimension_semantics<arbitrary>], iteration_bounds = array<i64: 1>, scalar_prefetch = 0 : i64, scratch_operands = 3 : i64, tpu.core_type = #tpu.core_type<tc>, window_params = [{transform_indices = @transform_0, window_bounds = array<i64: 1>}, {transform_indices = @transform_1, window_bounds = array<i64: 1>}, {transform_indices = @transform_2, window_bounds = array<i64: 16, 1024>}, {pipeline_mode = #tpu.pipeline_mode<synchronous>, transform_indices = @transform_3, window_bounds = array<i64: 1024, 256>}, {pipeline_mode = #tpu.pipeline_mode<synchronous>, transform_indices = @transform_4, window_bounds = array<i64: 1, 256>}, {pipeline_mode = #tpu.pipeline_mode<synchronous>, transform_indices = @transform_5, window_bounds = array<i64: 1, 128>}, {pipeline_mode = #tpu.pipeline_mode<synchronous>, transform_indices = @transform_6, window_bounds = array<i64: 1, 1024>}]} {
    %c0_i32 = arith.constant 0 : i32
    %0 = arith.cmpi eq, %arg0, %c0_i32 : i32
    %1 = arith.extui %0 : i1 to i32
    %c0_i32_0 = arith.constant 0 : i32
    %2 = arith.cmpi ne, %1, %c0_i32_0 : i32
    scf.if %2 {
      %cst_32 = arith.constant -1.000000e+30 : f32
      %68 = vector.broadcast %cst_32 : f32 to vector<1x1xf32>
      %c0_33 = arith.constant 0 : index
      %c0_34 = arith.constant 0 : index
      %69 = vector.load %arg8[%c0_33, %c0_34] : memref<1x1xf32, #tpu.memory_space<vmem>>, vector<1x1xf32>
      tpu.vector_store %arg8[%c0_33, %c0_34], %68 {strides = array<i32>} : memref<1x1xf32, #tpu.memory_space<vmem>>, vector<1x1xf32>,
      %cst_35 = arith.constant 0.000000e+00 : f32
      %70 = vector.broadcast %cst_35 : f32 to vector<1x1xf32>
      %c0_36 = arith.constant 0 : index
      %c0_37 = arith.constant 0 : index
      %71 = vector.load %arg9[%c0_36, %c0_37] : memref<1x1xf32, #tpu.memory_space<vmem>>, vector<1x1xf32>
      tpu.vector_store %arg9[%c0_36, %c0_37], %70 {strides = array<i32>} : memref<1x1xf32, #tpu.memory_space<vmem>>, vector<1x1xf32>,
      %cst_38 = arith.constant 0.000000e+00 : f32
      %72 = vector.broadcast %cst_38 : f32 to vector<1x1024xf32>
      %c0_39 = arith.constant 0 : index
      %c0_40 = arith.constant 0 : index
      %73 = vector.load %arg10[%c0_39, %c0_40] : memref<1x1024xf32, #tpu.memory_space<vmem>>, vector<1x1024xf32>
      tpu.vector_store %arg10[%c0_39, %c0_40], %72 {strides = array<i32>} : memref<1x1024xf32, #tpu.memory_space<vmem>>, vector<1x1024xf32>,
    } else {
    }
    %c16_i32 = arith.constant 16 : i32
    %3 = arith.muli %arg0, %c16_i32 : i32
    %4 = tpu.iota {dimensions = array<i32: 0>} : vector<16x1xi32>
    %5 = vector.broadcast %3 : i32 to vector<16x1xi32>
    %6 = arith.addi %5, %4 : vector<16x1xi32>
    %c0 = arith.constant 0 : index
    %7 = memref.load %arg1[%c0] : memref<1xi32, #tpu.memory_space<smem>>
    %8 = vector.broadcast %7 : i32 to vector<16x1xi32>
    %9 = arith.cmpi slt, %6, %8 : vector<16x1xi32>
    %c0_1 = arith.constant 0 : index
    %c0_2 = arith.constant 0 : index
    %10 = vector.load %arg3[%c0_1, %c0_2] : memref<16x1024xf32, #tpu.memory_space<vmem>>, vector<16x1024xf32>
    %cst = arith.constant 0.000000e+00 : f32
    %11 = vector.shape_cast %9 : vector<16x1xi1> to vector<16x1xi1>
    %12 = vector.broadcast %11 : vector<16x1xi1> to vector<16x1024xi1>
    %13 = vector.broadcast %cst : f32 to vector<16x1024xf32>
    %14 = arith.select %12, %10, %13 : vector<16x1024xi1>, vector<16x1024xf32>
    %15 = arith.truncf %14 : vector<16x1024xf32> to vector<16x1024xbf16>
    %c0_3 = arith.constant 0 : index
    %c0_4 = arith.constant 0 : index
    %16 = vector.load %arg4[%c0_3, %c0_4] : memref<1024x256xbf16, #tpu.memory_space<vmem>>, vector<1024x256xbf16>
    %cst_5 = arith.constant dense<0.000000e+00> : vector<16x256xf32>
    %17 = tpu.matmul %15, %16, %cst_5 {dimension_numbers = #tpu.dot_dimension_numbers<[1], [0], [0], [1], [0, 0, 1, 1], [], []>} : vector<16x1024xbf16>, vector<1024x256xbf16>, vector<16x256xf32> -> vector<16x256xf32>
    %c0_6 = arith.constant 0 : index
    %c0_7 = arith.constant 0 : index
    %18 = vector.load %arg5[%c0_6, %c0_7] : memref<1x256xf32, #tpu.memory_space<vmem>>, vector<1x256xf32>
    %19 = vector.broadcast %18 : vector<1x256xf32> to vector<16x256xf32>
    %20 = arith.addf %17, %19 : vector<16x256xf32>
    %21 = vector.extract_strided_slice %20 {offsets = [0, 0], sizes = [16, 128], strides = [1, 1]} : vector<16x256xf32> to vector<16x128xf32>
    %22 = math.tanh %21 : vector<16x128xf32>
    %23 = vector.extract_strided_slice %20 {offsets = [0, 128], sizes = [16, 128], strides = [1, 1]} : vector<16x256xf32> to vector<16x128xf32>
    %24 = arith.negf %23 : vector<16x128xf32>
    %25 = math.exp %24 : vector<16x128xf32>
    %cst_8 = arith.constant 1.000000e+00 : f32
    %26 = vector.broadcast %cst_8 : f32 to vector<16x128xf32>
    %27 = arith.addf %26, %25 : vector<16x128xf32>
    %28 = arith.divf %26, %27 : vector<16x128xf32>
    %29 = arith.mulf %22, %28 : vector<16x128xf32>
    %c0_9 = arith.constant 0 : index
    %c0_10 = arith.constant 0 : index
    %30 = vector.load %arg6[%c0_9, %c0_10] : memref<1x128xf32, #tpu.memory_space<vmem>>, vector<1x128xf32>
    %31 = vector.broadcast %30 : vector<1x128xf32> to vector<16x128xf32>
    %32 = arith.mulf %29, %31 : vector<16x128xf32>
    %cst_11 = arith.constant dense<0.000000e+00> : vector<16xf32>
    %33 = vector.multi_reduction <add>, %32, %cst_11 [1] : vector<16x128xf32> to vector<16xf32>
    %34 = vector.shape_cast %33 : vector<16xf32> to vector<16x1xf32>
    %c0_12 = arith.constant 0 : index
    %35 = memref.load %arg2[%c0_12] : memref<1xf32, #tpu.memory_space<smem>>
    %36 = vector.broadcast %35 : f32 to vector<16x1xf32>
    %37 = arith.addf %34, %36 : vector<16x1xf32>
    %cst_13 = arith.constant -1.000000e+30 : f32
    %38 = vector.broadcast %cst_13 : f32 to vector<16x1xf32>
    %39 = arith.select %9, %37, %38 : vector<16x1xi1>, vector<16x1xf32>
    %c0_14 = arith.constant 0 : index
    %c0_15 = arith.constant 0 : index
    %40 = vector.load %arg8[%c0_14, %c0_15] : memref<1x1xf32, #tpu.memory_space<vmem>>, vector<1x1xf32>
    %cst_16 = arith.constant dense<0xFF800000> : vector<1xf32>
    %41 = vector.multi_reduction <maximumf>, %39, %cst_16 [0] : vector<16x1xf32> to vector<1xf32>
    %42 = vector.shape_cast %41 : vector<1xf32> to vector<1x1xf32>
    %43 = arith.maximumf %40, %42 : vector<1x1xf32>
    %44 = arith.subf %40, %43 : vector<1x1xf32>
    %45 = math.exp %44 : vector<1x1xf32>
    %46 = vector.broadcast %43 : vector<1x1xf32> to vector<16x1xf32>
    %47 = arith.subf %39, %46 : vector<16x1xf32>
    %48 = math.exp %47 : vector<16x1xf32>
    %cst_17 = arith.constant 0.000000e+00 : f32
    %49 = vector.broadcast %cst_17 : f32 to vector<16x1xf32>
    %50 = arith.select %9, %48, %49 : vector<16x1xi1>, vector<16x1xf32>
    %c0_18 = arith.constant 0 : index
    %c0_19 = arith.constant 0 : index
    %51 = vector.load %arg9[%c0_18, %c0_19] : memref<1x1xf32, #tpu.memory_space<vmem>>, vector<1x1xf32>
    %52 = arith.mulf %45, %51 : vector<1x1xf32>
    %cst_20 = arith.constant dense<0.000000e+00> : vector<1xf32>
    %53 = vector.multi_reduction <add>, %50, %cst_20 [0] : vector<16x1xf32> to vector<1xf32>
    %54 = vector.shape_cast %53 : vector<1xf32> to vector<1x1xf32>
    %55 = arith.addf %52, %54 : vector<1x1xf32>
    %c0_21 = arith.constant 0 : index
    %c0_22 = arith.constant 0 : index
    %56 = vector.load %arg9[%c0_21, %c0_22] : memref<1x1xf32, #tpu.memory_space<vmem>>, vector<1x1xf32>
    tpu.vector_store %arg9[%c0_21, %c0_22], %55 {strides = array<i32>} : memref<1x1xf32, #tpu.memory_space<vmem>>, vector<1x1xf32>,
    %c0_23 = arith.constant 0 : index
    %c0_24 = arith.constant 0 : index
    %57 = vector.load %arg10[%c0_23, %c0_24] : memref<1x1024xf32, #tpu.memory_space<vmem>>, vector<1x1024xf32>
    %58 = vector.broadcast %45 : vector<1x1xf32> to vector<1x1024xf32>
    %59 = arith.mulf %58, %57 : vector<1x1024xf32>
    %60 = arith.truncf %50 : vector<16x1xf32> to vector<16x1xbf16>
    %cst_25 = arith.constant dense<0.000000e+00> : vector<1x1024xf32>
    %61 = tpu.matmul %60, %15, %cst_25 {dimension_numbers = #tpu.dot_dimension_numbers<[0], [0], [1], [1], [0, 1, 1, 1], [], []>} : vector<16x1xbf16>, vector<16x1024xbf16>, vector<1x1024xf32> -> vector<1x1024xf32>
    %62 = arith.addf %59, %61 : vector<1x1024xf32>
    %c0_26 = arith.constant 0 : index
    %c0_27 = arith.constant 0 : index
    %63 = vector.load %arg10[%c0_26, %c0_27] : memref<1x1024xf32, #tpu.memory_space<vmem>>, vector<1x1024xf32>
    tpu.vector_store %arg10[%c0_26, %c0_27], %62 {strides = array<i32>} : memref<1x1024xf32, #tpu.memory_space<vmem>>, vector<1x1024xf32>,
    %c0_28 = arith.constant 0 : index
    %c0_29 = arith.constant 0 : index
    %64 = vector.load %arg8[%c0_28, %c0_29] : memref<1x1xf32, #tpu.memory_space<vmem>>, vector<1x1xf32>
    tpu.vector_store %arg8[%c0_28, %c0_29], %43 {strides = array<i32>} : memref<1x1xf32, #tpu.memory_space<vmem>>, vector<1x1xf32>,
    %c0_i32_30 = arith.constant 0 : i32
    %65 = arith.cmpi eq, %arg0, %c0_i32_30 : i32
    %66 = arith.extui %65 : i1 to i32
    %c0_i32_31 = arith.constant 0 : i32
    %67 = arith.cmpi ne, %66, %c0_i32_31 : i32
    scf.if %67 {
      %c0_32 = arith.constant 0 : index
      %c0_33 = arith.constant 0 : index
      %68 = vector.load %arg9[%c0_32, %c0_33] : memref<1x1xf32, #tpu.memory_space<vmem>>, vector<1x1xf32>
      %cst_34 = arith.constant 1.000000e-30 : f32
      %69 = vector.broadcast %cst_34 : f32 to vector<1x1xf32>
      %70 = arith.maximumf %68, %69 : vector<1x1xf32>
      %c0_35 = arith.constant 0 : index
      %c0_36 = arith.constant 0 : index
      %71 = vector.load %arg10[%c0_35, %c0_36] : memref<1x1024xf32, #tpu.memory_space<vmem>>, vector<1x1024xf32>
      %72 = vector.broadcast %70 : vector<1x1xf32> to vector<1x1024xf32>
      %73 = arith.divf %71, %72 : vector<1x1024xf32>
      %c0_37 = arith.constant 0 : index
      %c0_38 = arith.constant 0 : index
      %74 = vector.load %arg7[%c0_37, %c0_38] : memref<1x1024xf32, #tpu.memory_space<vmem>>, vector<1x1024xf32>
      tpu.vector_store %arg7[%c0_37, %c0_38], %73 {strides = array<i32>} : memref<1x1024xf32, #tpu.memory_space<vmem>>, vector<1x1024xf32>,
    } else {
    }
    return
  }
  func.func @transform_0(%arg0: i32) -> i32 {
    %c0_i32 = arith.constant 0 : i32
    %c0_i32_0 = arith.constant 0 : i32
    return %c0_i32 : i32
  }
  func.func @transform_1(%arg0: i32) -> i32 {
    %c0_i32 = arith.constant 0 : i32
    %c0_i32_0 = arith.constant 0 : i32
    return %c0_i32 : i32
  }
  func.func @transform_2(%arg0: i32) -> (i32, i32) {
    %c0_i32 = arith.constant 0 : i32
    %c0_i32_0 = arith.constant 0 : i32
    return %arg0, %c0_i32 : i32, i32
  }
  func.func @transform_3(%arg0: i32) -> (i32, i32) {
    %c0_i32 = arith.constant 0 : i32
    %c0_i32_0 = arith.constant 0 : i32
    %c0_i32_1 = arith.constant 0 : i32
    return %c0_i32, %c0_i32_0 : i32, i32
  }
  func.func @transform_4(%arg0: i32) -> (i32, i32) {
    %c0_i32 = arith.constant 0 : i32
    %c0_i32_0 = arith.constant 0 : i32
    %c0_i32_1 = arith.constant 0 : i32
    return %c0_i32, %c0_i32_0 : i32, i32
  }
  func.func @transform_5(%arg0: i32) -> (i32, i32) {
    %c0_i32 = arith.constant 0 : i32
    %c0_i32_0 = arith.constant 0 : i32
    %c0_i32_1 = arith.constant 0 : i32
    return %c0_i32, %c0_i32_0 : i32, i32
  }
  func.func @transform_6(%arg0: i32) -> (i32, i32) {
    %c0_i32 = arith.constant 0 : i32
    %c0_i32_0 = arith.constant 0 : i32
    %c0_i32_1 = arith.constant 0 : i32
    return %c0_i32, %c0_i32_0 : i32, i32
  }
}

</mosaic_0001>

<bundles_post_ra>
// kernel: tpu_custom_call.1
= control target key start
LH: loop header
LB: loop body
LE: loop exit
PB: predicated region body
PF: predicated region fallthrough
CT: control target
= control target key end

     0   :  { %13 = vsyncpa [#allocation8], 0  ;;  %s2138_s0 = inlined_call_operand.<no memory space> [shape: s32[1], index: 0, kind: input, shape index: {}]   ;;  %s2139_s1 = inlined_call_operand.<no memory space> [shape: f32[1], index: 1, kind: input, shape index: {}]   ;;  %s2140_s2 = inlined_call_operand.hbm [shape: f32[16,1024], index: 2, kind: input, shape index: {}]   ;;  %s2141_s3 = inlined_call_operand.hbm [shape: bf16[1024,256], index: 3, kind: input, shape index: {}]   ;;  %s2142_s4 = inlined_call_operand.vmem [shape: f32[1,256], index: 4, kind: input, shape index: {}]   ;;  %s2143_s5 = inlined_call_operand.vmem [shape: f32[1,128], index: 5, kind: input, shape index: {}]   ;;  %s2144_s6 = inlined_call_operand.hbm [shape: f32[1,1024], index: 6, kind: output, shape index: {}]  }
   0x1   :  { %14 = vsyncpa [#allocation11], 0 }
   0x2   :  { %15 = vsyncpa [#allocation9], 0  ;;  %s1933_s21 = smov [#allocation7]   ;;  %s1861_s25 = scalar_lea.hbm %s2140_s2, 2048 }
   0x3   :  { %s25_s22 = sshll.u32 %s1933_s21, 4  ;;  %p1862_p0 = scmp.ne.s32.totalorder %s2140_s2, %s1861_s25  ;;  %s26_s22 = int_to_ptr.vmem [resolvable:$true] %s25_s22 }
   0x4   :  { %p1865_p1 = scmp.lt.u32.totalorder %s1861_s25, %s2140_s2 }
   0x6   :  { %p1867_p2 = pnand %p1865_p1, %p1862_p0 }
   0x8   :  { %1870 = shalt.err (!%p1867_p2)
}
   0x9   :  { %s1871_s30 = scalar_lea.vmem %s26_s22, 2048  ;;  %p1876_p4 = scmp.lt.s32.totalorder %s26_s22, %s26_s22 }
   0xa   :  { %p1872_p3 = scmp.ne.s32.totalorder %s26_s22, %s1871_s30  ;;  %p1877_p5 = scmp.lt.s32.totalorder %s1871_s30, %s1871_s30 }
   0xc   :  { %p1878_p6 = por %p1877_p5, %p1876_p4 }
   0xe   :  { %p1879_p7 = pnand %p1878_p6, %p1872_p3 }
  0x10   :  { %1882 = shalt.err (!%p1879_p7)
}
  0x11   :  { %s1934_s7 = smov 1024   ;;  %s1935_s8 = smov 64  }
  0x12   :  { %31 = dma.hbm_to_vmem [thread:$0]  %s2140_s2, 2048, %s26_s22, [#allocation8], %s1934_s7, %s1934_s7, %s1935_s8  }
  0x13   :  { %s1936_s11 = smov [#allocation10]   ;;  %s1883_s15 = scalar_lea.hbm %s2141_s3, 16384 }
  0x14   :  { %s37_s12 = sshll.u32 %s1936_s11, 4  ;;  %p1884_p8 = scmp.ne.s32.totalorder %s2141_s3, %s1883_s15  ;;  %s38_s12 = int_to_ptr.vmem [resolvable:$true] %s37_s12 }
  0x15   :  { %p1887_p9 = scmp.lt.u32.totalorder %s1883_s15, %s2141_s3 }
  0x17   :  { %p1889_p10 = pnand %p1887_p9, %p1884_p8 }
  0x19   :  { %1892 = shalt.err (!%p1889_p10)
}
  0x1a   :  { %s1893_s20 = scalar_lea.vmem %s38_s12, 16384  ;;  %p1898_p12 = scmp.lt.s32.totalorder %s38_s12, %s38_s12 }
  0x1b   :  { %p1894_p11 = scmp.ne.s32.totalorder %s38_s12, %s1893_s20  ;;  %p1899_p13 = scmp.lt.s32.totalorder %s1893_s20, %s1893_s20 }
  0x1d   :  { %p1900_p0 = por %p1899_p13, %p1898_p12 }
  0x1f   :  { %p1901_p1 = pnand %p1900_p0, %p1894_p11 }
  0x21   :  { %1904 = shalt.err (!%p1901_p1)
}
  0x22   :  { %s1937_s2 = smov 128   ;;  %s1938_s21 = smov 8  }
  0x23   :  { %43 = dma.hbm_to_vmem [thread:$0]  %s2141_s3, 16384, %s38_s12, [#allocation11], %s1937_s2, %s1937_s2, %s1938_s21  }
  0x24   :  { %1927 = dma.done.wait [#allocation8], 2048  }
  0x25   :  { %1928 = vsyncadd [#allocation8], 4294965248 }
  0x26   :  { %1929 = dma.done.wait [#allocation11], 16384  }
  0x27   :  { %1930 = vsyncadd [#allocation11], 4294950912  ;;  %v1649_v0 = vld [vmem:[#allocation10 + $0x4] ss:$8 sps:$4 sm:$0xff]   ;;  %v1653_v2 = vld [vmem:[#allocation10] ss:$8 sps:$4 sm:$0xff]   ;;  %v64_v33 = vlaneseq  ;;  %v71_v45 = vstv %s2138_s0 }
  0x28   :  { %v1651_v1 = vld [vmem:[#allocation10 + $0x204] ss:$8 sps:$4 sm:$0xff]   ;;  %898 = vmatprep.subr.bf16.mxu1 %v1649_v0  ;;  %v1654_v3 = vld [vmem:[#allocation10 + $0x200] ss:$8 sps:$4 sm:$0xff]   ;;  %v1655_v4 = vld [vmem:[#allocation10 + $0x14] ss:$8 sps:$4 sm:$0xff]  }
  0x29   :  { %984 = vmatprep.subr.bf16.mxu0 %v1651_v1  ;;  %899 = vmatpush1.bf16.msra.mxu1 %v1653_v2  ;;  %v1657_v5 = vld [vmem:[#allocation10 + $0x214] ss:$8 sps:$4 sm:$0xff]   ;;  %v1659_v6 = vld [vmem:[#allocation10 + $0x10] ss:$8 sps:$4 sm:$0xff]   ;;  %v1661_v8 = vld [vmem:[#allocation10 + $0x24] ss:$8 sps:$4 sm:$0xff]  }
  0x2a   :  { %985 = vmatpush1.bf16.msra.mxu0 %v1654_v3  ;;  %900 = vmatprep.subr.bf16.mxu1 %v1655_v4  ;;  %v1660_v7 = vld [vmem:[#allocation10 + $0x210] ss:$8 sps:$4 sm:$0xff]   ;;  %v1663_v9 = vld [vmem:[#allocation10 + $0x224] ss:$8 sps:$4 sm:$0xff]   ;;  %v1665_v10 = vld [vmem:[#allocation10 + $0x20] ss:$8 sps:$4 sm:$0xff]  }
  0x2b   :  { %986 = vmatprep.subr.bf16.mxu0 %v1657_v5  ;;  %v1666_v11 = vld [vmem:[#allocation10 + $0x220] ss:$8 sps:$4 sm:$0xff]   ;;  %v1667_v12 = vld [vmem:[#allocation10 + $0x34] ss:$8 sps:$4 sm:$0xff]   ;;  %v1671_v14 = vld [vmem:[#allocation10 + $0x30] ss:$8 sps:$4 sm:$0xff]  }
  0x2c   :  { %v1669_v13 = vld [vmem:[#allocation10 + $0x234] ss:$8 sps:$4 sm:$0xff]   ;;  %v1672_v15 = vld [vmem:[#allocation10 + $0x230] ss:$8 sps:$4 sm:$0xff]   ;;  %v1673_v16 = vld [vmem:[#allocation10 + $0x44] ss:$8 sps:$4 sm:$0xff]  }
  0x2d   :  { %901 = vmatpush1.bf16.msra.mxu1 %v1659_v6  ;;  %v1675_v17 = vld [vmem:[#allocation10 + $0x244] ss:$8 sps:$4 sm:$0xff]   ;;  %v1677_v18 = vld [vmem:[#allocation10 + $0x40] ss:$8 sps:$4 sm:$0xff]   ;;  %v1679_v20 = vld [vmem:[#allocation10 + $0x54] ss:$8 sps:$4 sm:$0xff]  }
  0x2e   :  { %987 = vmatpush1.bf16.msra.mxu0 %v1660_v7  ;;  %902 = vmatprep.subr.bf16.mxu1 %v1661_v8  ;;  %v1678_v19 = vld [vmem:[#allocation10 + $0x240] ss:$8 sps:$4 sm:$0xff]   ;;  %v1681_v21 = vld [vmem:[#allocation10 + $0x254] ss:$8 sps:$4 sm:$0xff]   ;;  %v1683_v22 = vld [vmem:[#allocation10 + $0x50] ss:$8 sps:$4 sm:$0xff]  }
  0x2f   :  { %988 = vmatprep.subr.bf16.mxu0 %v1663_v9  ;;  %v1684_v23 = vld [vmem:[#allocation10 + $0x250] ss:$8 sps:$4 sm:$0xff]   ;;  %v1685_v24 = vld [vmem:[#allocation10 + $0x64] ss:$8 sps:$4 sm:$0xff]   ;;  %v1689_v26 = vld [vmem:[#allocation10 + $0x60] ss:$8 sps:$4 sm:$0xff]  }
  0x30   :  { %v1687_v25 = vld [vmem:[#allocation10 + $0x264] ss:$8 sps:$4 sm:$0xff]   ;;  %v1690_v27 = vld [vmem:[#allocation10 + $0x260] ss:$8 sps:$4 sm:$0xff]   ;;  %v1691_v28 = vld [vmem:[#allocation10 + $0x74] ss:$8 sps:$4 sm:$0xff]  }
  0x31   :  { %903 = vmatpush1.bf16.msra.mxu1 %v1665_v10  ;;  %v1693_v29 = vld [vmem:[#allocation10 + $0x274] ss:$8 sps:$4 sm:$0xff]   ;;  %v1695_v30 = vld [vmem:[#allocation10 + $0x70] ss:$8 sps:$4 sm:$0xff]   ;;  %v1697_v32 = vld [vmem:[#allocation10 + $0x84] ss:$8 sps:$4 sm:$0xff]  }
  0x32   :  { %989 = vmatpush1.bf16.msra.mxu0 %v1666_v11  ;;  %904 = vmatprep.subr.bf16.mxu1 %v1667_v12  ;;  %v1696_v31 = vld [vmem:[#allocation10 + $0x270] ss:$8 sps:$4 sm:$0xff]   ;;  %v1699_v34 = vld [vmem:[#allocation10 + $0x284] ss:$8 sps:$4 sm:$0xff]   ;;  %v1701_v35 = vld [vmem:[#allocation10 + $0x80] ss:$8 sps:$4 sm:$0xff]  }
  0x33   :  { %990 = vmatprep.subr.bf16.mxu0 %v1669_v13  ;;  %v1702_v36 = vld [vmem:[#allocation10 + $0x280] ss:$8 sps:$4 sm:$0xff]   ;;  %v1703_v37 = vld [vmem:[#allocation10 + $0x94] ss:$8 sps:$4 sm:$0xff]   ;;  %v2003_v38 = vshrl.u32 %v64_v33, 7  ;;  %vm59_vm3 = vcmask 0  }
  0x34   :  { %v1705_v39 = vld [vmem:[#allocation10 + $0x294] ss:$8 sps:$4 sm:$0xff]   ;;  %v1707_v40 = vld [vmem:[#allocation10 + $0x90] ss:$8 sps:$4 sm:$0xff]   ;;  %v1709_v42 = vld [vmem:[#allocation10 + $0xa4] ss:$8 sps:$4 sm:$0xff]  }
  0x35   :  { %905 = vmatpush1.bf16.msra.mxu1 %v1671_v14  ;;  %v1708_v41 = vld [vmem:[#allocation10 + $0x290] ss:$8 sps:$4 sm:$0xff]   ;;  %v66_v43 = vadd.s32 8, %v2003_v38  ;;  %v1711_v44 = vld [vmem:[#allocation10 + $0x2a4] ss:$8 sps:$4 sm:$0xff]   ;;  %vm2010_vm0 = vcmp.lt.s32.totalorder %v2003_v38, %v71_v45  ;;  %vm1133_vm4 = vcmask 7168  }
  0x36   :  { %991 = vmatpush1.bf16.msra.mxu0 %v1672_v15  ;;  %906 = vmatprep.subr.bf16.mxu1 %v1673_v16  ;;  %v1713_v46 = vld [vmem:[#allocation10 + $0xa0] ss:$8 sps:$4 sm:$0xff]   ;;  %v1715_v48 = vld [vmem:[#allocation10 + $0xb4] ss:$8 sps:$4 sm:$0xff]   ;;  %v1719_v52 = vld [vmem:[#allocation10 + $0xb0] ss:$8 sps:$4 sm:$0xff]  }
  0x37   :  { %992 = vmatprep.subr.bf16.mxu0 %v1675_v17  ;;  %v1714_v47 = vld [vmem:[#allocation10 + $0x2a0] ss:$8 sps:$4 sm:$0xff]   ;;  %vm2014_vm1 = vcmp.lt.s32.totalorder %v66_v43, %v71_v45  ;;  %v1717_v51 = vld [vmem:[#allocation10 + $0x2b4] ss:$8 sps:$4 sm:$0xff]   ;;  %v1720_v53 = vld [vmem:[#allocation10 + $0x2b0] ss:$8 sps:$4 sm:$0xff]  }
  0x38   :  { %v75_v54 = vld [vmem:[#allocation7 + $0x8] sm:$0xff]  ;;  %vm2022_vm2 = vmpackc.low %vm2014_vm1, %vm2010_vm0  ;;  %v1727_v1 = vld [vmem:[#allocation10 + $0xd4] ss:$8 sps:$4 sm:$0xff]   ;;  %vm1174_vm5 = vcmask 130048  }
  0x39   :  { %907 = vmatpush1.bf16.msra.mxu1 %v1677_v18  ;;  %v83_v55 = vld [vmem:[#allocation7 + $0x48] sm:$0xff]  ;;  %v1729_v2 = vld [vmem:[#allocation10 + $0x2d4] ss:$8 sps:$4 sm:$0xff]   ;;  %v1731_v3 = vld [vmem:[#allocation10 + $0xd0] ss:$8 sps:$4 sm:$0xff]  }
  0x3a   :  { %993 = vmatpush1.bf16.msra.mxu0 %v1678_v19  ;;  %908 = vmatprep.subr.bf16.mxu1 %v1679_v20  ;;  %v1721_v57 = vld [vmem:[#allocation10 + $0xc4] ss:$8 sps:$4 sm:$0xff]   ;;  %v2026_v59 = vpack.c.bf16 %v83_v55, %v75_v54  ;;  %v1725_v63 = vld [vmem:[#allocation10 + $0xc0] ss:$8 sps:$4 sm:$0xff]   ;;  %v1732_v4 = vld [vmem:[#allocation10 + $0x2d0] ss:$8 sps:$4 sm:$0xff]  }
  0x3b   :  { %994 = vmatprep.subr.bf16.mxu0 %v1681_v21  ;;  %v1723_v58 = vld [vmem:[#allocation10 + $0x2c4] ss:$8 sps:$4 sm:$0xff]   ;;  %v1726_v0 = vld [vmem:[#allocation10 + $0x2c0] ss:$8 sps:$4 sm:$0xff]   ;;  %v1739_v9 = vld [vmem:[#allocation10 + $0xf4] ss:$8 sps:$4 sm:$0xff]  }
  0x3c   :  { %v79_v60 = vld [vmem:[#allocation7 + $0x28] sm:$0xff]  ;;  %1567 = vmatprep.mubr.msk.bf16.mxu1 %vm2022_vm2, %v2026_v59  ;;  %v1741_v10 = vld [vmem:[#allocation10 + $0x2f4] ss:$8 sps:$4 sm:$0xff]   ;;  %v1743_v11 = vld [vmem:[#allocation10 + $0xf0] ss:$8 sps:$4 sm:$0xff]  }
  0x3d   :  { %909 = vmatpush1.bf16.msra.mxu1 %v1683_v22  ;;  %v87_v61 = vld [vmem:[#allocation7 + $0x68] sm:$0xff]  ;;  %v1744_v12 = vld [vmem:[#allocation10 + $0x2f0] ss:$8 sps:$4 sm:$0xff]   ;;  %v74_v13 = vld [vmem:[#allocation7] sm:$0xff] }
  0x3e   :  { %995 = vmatpush1.bf16.msra.mxu0 %v1684_v23  ;;  %910 = vmatprep.subr.bf16.mxu1 %v1685_v24  ;;  %v2031_v62 = vpack.c.bf16 %v87_v61, %v79_v60  ;;  %v1733_v5 = vld [vmem:[#allocation10 + $0xe4] ss:$8 sps:$4 sm:$0xff]   ;;  %v1737_v7 = vld [vmem:[#allocation10 + $0xe0] ss:$8 sps:$4 sm:$0xff]   ;;  %v1753_v23 = vld [vmem:[#allocation10 + $0x114] ss:$8 sps:$4 sm:$0xff]  }
  0x3f   :  { %996 = vmatprep.subr.bf16.mxu0 %v1687_v25  ;;  %v1735_v6 = vld [vmem:[#allocation10 + $0x2e4] ss:$8 sps:$4 sm:$0xff]   ;;  %v1738_v8 = vld [vmem:[#allocation10 + $0x2e0] ss:$8 sps:$4 sm:$0xff]   ;;  %v1756_v24 = vld [vmem:[#allocation10 + $0x314] ss:$8 sps:$4 sm:$0xff]  }
  0x40   :  { %1579 = vmatprep.mubr.msk.bf16.mxu0 %vm2022_vm2, %v2031_v62  ;;  %v82_v14 = vld [vmem:[#allocation7 + $0x40] sm:$0xff]  ;;  %v1751_v25 = vld [vmem:[#allocation10 + $0x110] ss:$8 sps:$4 sm:$0xff]  }
  0x41   :  { %911 = vmatpush1.bf16.msra.mxu1 %v1689_v26  ;;  %v78_v15 = vld [vmem:[#allocation7 + $0x20] sm:$0xff]  ;;  %v2036_v20 = vpack.c.bf16 %v82_v14, %v74_v13  ;;  %v1754_v26 = vld [vmem:[#allocation10 + $0x310] ss:$8 sps:$4 sm:$0xff]  }
  0x42   :  { %997 = vmatpush1.bf16.msra.mxu0 %v1690_v27  ;;  %912 = vmatprep.subr.bf16.mxu1 %v1691_v28  ;;  %v86_v16 = vld [vmem:[#allocation7 + $0x60] sm:$0xff]  ;;  %v1763_v33 = vld [vmem:[#allocation10 + $0x130] ss:$8 sps:$4 sm:$0xff]  }
  0x43   :  { %998 = vmatprep.subr.bf16.mxu0 %v1693_v29  ;;  %v1747_v17 = vld [vmem:[#allocation10 + $0x104] ss:$8 sps:$4 sm:$0xff]   ;;  %v1745_v19 = vld [vmem:[#allocation10 + $0x100] ss:$8 sps:$4 sm:$0xff]   ;;  %v2038_v21 = vpack.c.bf16 %v86_v16, %v78_v15  ;;  %v1778_v43 = vld [vmem:[#allocation10 + $0x350] ss:$8 sps:$4 sm:$0xff]  }
  0x44   :  { %v1750_v18 = vld [vmem:[#allocation10 + $0x304] ss:$8 sps:$4 sm:$0xff]   ;;  %v1748_v22 = vld [vmem:[#allocation10 + $0x300] ss:$8 sps:$4 sm:$0xff]   ;;  %v81_v55 = vld [vmem:[#allocation7 + $0x38] sm:$0xff] }
  0x45   :  { %913 = vmatpush1.bf16.msra.mxu1 %v1695_v30  ;;  %v1759_v27 = vld [vmem:[#allocation10 + $0x124] ss:$8 sps:$4 sm:$0xff]   ;;  %v1757_v29 = vld [vmem:[#allocation10 + $0x120] ss:$8 sps:$4 sm:$0xff]   ;;  %v1787_v60 = vld [vmem:[#allocation10 + $0x170] ss:$8 sps:$4 sm:$0xff]  }
  0x46   :  { %999 = vmatpush1.bf16.msra.mxu0 %v1696_v31  ;;  %914 = vmatprep.subr.bf16.mxu1 %v1697_v32  ;;  %v1762_v28 = vld [vmem:[#allocation10 + $0x324] ss:$8 sps:$4 sm:$0xff]   ;;  %v1760_v30 = vld [vmem:[#allocation10 + $0x320] ss:$8 sps:$4 sm:$0xff]   ;;  %v1765_v31 = vld [vmem:[#allocation10 + $0x134] ss:$8 sps:$4 sm:$0xff]  }
  0x47   :  { %1000 = vmatprep.subr.bf16.mxu0 %v1699_v34  ;;  %v1768_v32 = vld [vmem:[#allocation10 + $0x334] ss:$8 sps:$4 sm:$0xff]   ;;  %v1766_v34 = vld [vmem:[#allocation10 + $0x330] ss:$8 sps:$4 sm:$0xff]   ;;  %v1786_v45 = vld [vmem:[#allocation10 + $0x364] ss:$8 sps:$4 sm:$0xff]  }
  0x48   :  { %v1790_v61 = vld [vmem:[#allocation10 + $0x370] ss:$8 sps:$4 sm:$0xff]   ;;  %v1819_v15 = vld [vmem:[#allocation10 + $0x1c4] ss:$8 sps:$4 sm:$0xff]  }
  0x49   :  { %915 = vmatpush1.bf16.msra.mxu1 %v1701_v35  ;;  %v1771_v35 = vld [vmem:[#allocation10 + $0x144] ss:$8 sps:$4 sm:$0xff]   ;;  %v1811_v13 = vld [vmem:[#allocation10 + $0x1b0] ss:$8 sps:$4 sm:$0xff]  }
  0x4a   :  { %1001 = vmatpush1.bf16.msra.mxu0 %v1702_v36  ;;  %916 = vmatprep.subr.bf16.mxu1 %v1703_v37  ;;  %v1774_v36 = vld [vmem:[#allocation10 + $0x344] ss:$8 sps:$4 sm:$0xff]   ;;  %v1769_v37 = vld [vmem:[#allocation10 + $0x140] ss:$8 sps:$4 sm:$0xff]   ;;  %v1814_v14 = vld [vmem:[#allocation10 + $0x3b0] ss:$8 sps:$4 sm:$0xff]  }
  0x4b   :  { %1002 = vmatprep.subr.bf16.mxu0 %v1705_v39  ;;  %v1772_v39 = vld [vmem:[#allocation10 + $0x340] ss:$8 sps:$4 sm:$0xff]   ;;  %v1822_v16 = vld [vmem:[#allocation10 + $0x3c4] ss:$8 sps:$4 sm:$0xff]  }
  0x4d   :  { %917 = vmatpush1.bf16.msra.mxu1 %v1707_v40  ;;  %v1777_v40 = vld [vmem:[#allocation10 + $0x154] ss:$8 sps:$4 sm:$0xff]  }
  0x4e   :  { %1003 = vmatpush1.bf16.msra.mxu0 %v1708_v41  ;;  %918 = vmatprep.subr.bf16.mxu1 %v1709_v42  ;;  %v1780_v41 = vld [vmem:[#allocation10 + $0x354] ss:$8 sps:$4 sm:$0xff]   ;;  %v1775_v42 = vld [vmem:[#allocation10 + $0x150] ss:$8 sps:$4 sm:$0xff]  }
  0x4f   :  { %1004 = vmatprep.subr.bf16.mxu0 %v1711_v44  ;;  %v1783_v44 = vld [vmem:[#allocation10 + $0x164] ss:$8 sps:$4 sm:$0xff]  }
  0x51   :  { %919 = vmatpush1.bf16.msra.mxu1 %v1713_v46  ;;  %v1781_v46 = vld [vmem:[#allocation10 + $0x160] ss:$8 sps:$4 sm:$0xff]  }
  0x52   :  { %1005 = vmatpush1.bf16.msra.mxu0 %v1714_v47  ;;  %920 = vmatprep.subr.bf16.mxu1 %v1715_v48  ;;  %v1784_v47 = vld [vmem:[#allocation10 + $0x360] ss:$8 sps:$4 sm:$0xff]   ;;  %v1789_v48 = vld [vmem:[#allocation10 + $0x174] ss:$8 sps:$4 sm:$0xff]  }
  0x53   :  { %1006 = vmatprep.subr.bf16.mxu0 %v1717_v51  ;;  %v77_v51 = vld [vmem:[#allocation7 + $0x18] sm:$0xff] }
  0x55   :  { %921 = vmatpush1.bf16.msra.mxu1 %v1719_v52  ;;  %v85_v52 = vld [vmem:[#allocation7 + $0x58] sm:$0xff] }
  0x56   :  { %1007 = vmatpush1.bf16.msra.mxu0 %v1720_v53  ;;  %922 = vmatprep.subr.bf16.mxu1 %v1721_v57  ;;  %v1792_v53 = vld [vmem:[#allocation10 + $0x374] ss:$8 sps:$4 sm:$0xff]   ;;  %v2046_v54 = vpack.c.bf16 %v85_v52, %v77_v51 }
  0x57   :  { %1008 = vmatprep.subr.bf16.mxu0 %v1723_v58  ;;  %v89_v57 = vld [vmem:[#allocation7 + $0x78] sm:$0xff] }
  0x58   :  { %v2048_v58 = vpack.c.bf16 %v89_v57, %v81_v55 }
  0x59   :  { %923 = vmatpush1.bf16.msra.mxu1 %v1725_v63  ;;  %v1795_v63 = vld [vmem:[#allocation10 + $0x184] ss:$8 sps:$4 sm:$0xff]  }
  0x5a   :  { %1009 = vmatpush1.bf16.msra.mxu0 %v1726_v0  ;;  %924 = vmatprep.subr.bf16.mxu1 %v1727_v1  ;;  %v1798_v0 = vld [vmem:[#allocation10 + $0x384] ss:$8 sps:$4 sm:$0xff]   ;;  %v1793_v1 = vld [vmem:[#allocation10 + $0x180] ss:$8 sps:$4 sm:$0xff]  }
  0x5b   :  { %1010 = vmatprep.subr.bf16.mxu0 %v1729_v2  ;;  %v1796_v2 = vld [vmem:[#allocation10 + $0x380] ss:$8 sps:$4 sm:$0xff]  }
  0x5d   :  { %925 = vmatpush1.bf16.msra.mxu1 %v1731_v3  ;;  %v1801_v3 = vld [vmem:[#allocation10 + $0x194] ss:$8 sps:$4 sm:$0xff]  }
  0x5e   :  { %1011 = vmatpush1.bf16.msra.mxu0 %v1732_v4  ;;  %926 = vmatprep.subr.bf16.mxu1 %v1733_v5  ;;  %v1804_v4 = vld [vmem:[#allocation10 + $0x394] ss:$8 sps:$4 sm:$0xff]   ;;  %v1799_v5 = vld [vmem:[#allocation10 + $0x190] ss:$8 sps:$4 sm:$0xff]  }
  0x5f   :  { %1012 = vmatprep.subr.bf16.mxu0 %v1735_v6  ;;  %v1802_v6 = vld [vmem:[#allocation10 + $0x390] ss:$8 sps:$4 sm:$0xff]  }
  0x61   :  { %927 = vmatpush1.bf16.msra.mxu1 %v1737_v7  ;;  %v1807_v7 = vld [vmem:[#allocation10 + $0x1a4] ss:$8 sps:$4 sm:$0xff]  }
  0x62   :  { %1013 = vmatpush1.bf16.msra.mxu0 %v1738_v8  ;;  %928 = vmatprep.subr.bf16.mxu1 %v1739_v9  ;;  %v1810_v8 = vld [vmem:[#allocation10 + $0x3a4] ss:$8 sps:$4 sm:$0xff]   ;;  %v1805_v9 = vld [vmem:[#allocation10 + $0x1a0] ss:$8 sps:$4 sm:$0xff]  }
  0x63   :  { %1014 = vmatprep.subr.bf16.mxu0 %v1741_v10  ;;  %v1808_v10 = vld [vmem:[#allocation10 + $0x3a0] ss:$8 sps:$4 sm:$0xff]  }
  0x65   :  { %929 = vmatpush1.bf16.msra.mxu1 %v1743_v11  ;;  %v1813_v11 = vld [vmem:[#allocation10 + $0x1b4] ss:$8 sps:$4 sm:$0xff]  }
  0x66   :  { %1015 = vmatpush1.bf16.msra.mxu0 %v1744_v12  ;;  %941 = vmatprep.subr.bf16.mxu1 %v1747_v17  ;;  %v1816_v12 = vld [vmem:[#allocation10 + $0x3b4] ss:$8 sps:$4 sm:$0xff]   ;;  %v1817_v17 = vld [vmem:[#allocation10 + $0x1c0] ss:$8 sps:$4 sm:$0xff]  }
  0x67   :  { %1027 = vmatprep.subr.bf16.mxu0 %v1750_v18  ;;  %v1820_v18 = vld [vmem:[#allocation10 + $0x3c0] ss:$8 sps:$4 sm:$0xff]  }
  0x68   :  { %1570 = vmatmul.mubr.msk.bf16.vlgmr.msra.gmra.mrb[0].mxu1 %vm2022_vm2, %v2036_v20 }
  0x69   :  { %1582 = vmatmul.mubr.msk.bf16.vlgmr.msra.gmra.mrb[0].mxu0 %vm2022_vm2, %v2038_v21  ;;  %942 = vmatpush1.bf16.msra.mxu1 %v1745_v19  ;;  %v1825_v19 = vld [vmem:[#allocation10 + $0x1d4] ss:$8 sps:$4 sm:$0xff]  }
  0x6a   :  { %1028 = vmatpush1.bf16.msra.mxu0 %v1748_v22  ;;  %943 = vmatprep.subr.bf16.mxu1 %v1753_v23  ;;  %v1828_v22 = vld [vmem:[#allocation10 + $0x3d4] ss:$8 sps:$4 sm:$0xff]   ;;  %v1823_v23 = vld [vmem:[#allocation10 + $0x1d0] ss:$8 sps:$4 sm:$0xff]  }
  0x6b   :  { %1029 = vmatprep.subr.bf16.mxu0 %v1756_v24  ;;  %1573 = vmatprep.mubr.msk.bf16.mxu1 %vm2022_vm2, %v2046_v54  ;;  %v1826_v24 = vld [vmem:[#allocation10 + $0x3d0] ss:$8 sps:$4 sm:$0xff]  }
  0x6c   :  { %1585 = vmatprep.mubr.msk.bf16.mxu0 %vm2022_vm2, %v2048_v58 }
  0x6d   :  { %944 = vmatpush1.bf16.msra.mxu1 %v1751_v25  ;;  %v1831_v25 = vld [vmem:[#allocation10 + $0x1e4] ss:$8 sps:$4 sm:$0xff]  }
  0x6e   :  { %1030 = vmatpush1.bf16.msra.mxu0 %v1754_v26  ;;  %945 = vmatprep.subr.bf16.mxu1 %v1759_v27  ;;  %v1834_v26 = vld [vmem:[#allocation10 + $0x3e4] ss:$8 sps:$4 sm:$0xff]   ;;  %v1829_v27 = vld [vmem:[#allocation10 + $0x1e0] ss:$8 sps:$4 sm:$0xff]  }
  0x6f   :  { %1031 = vmatprep.subr.bf16.mxu0 %v1762_v28  ;;  %v1832_v28 = vld [vmem:[#allocation10 + $0x3e0] ss:$8 sps:$4 sm:$0xff]  }
  0x71   :  { %946 = vmatpush1.bf16.msra.mxu1 %v1757_v29  ;;  %v1837_v29 = vld [vmem:[#allocation10 + $0x1f4] ss:$8 sps:$4 sm:$0xff]  }
  0x72   :  { %1032 = vmatpush1.bf16.msra.mxu0 %v1760_v30  ;;  %947 = vmatprep.subr.bf16.mxu1 %v1765_v31  ;;  %v1840_v30 = vld [vmem:[#allocation10 + $0x3f4] ss:$8 sps:$4 sm:$0xff]   ;;  %v1835_v31 = vld [vmem:[#allocation10 + $0x1f0] ss:$8 sps:$4 sm:$0xff]  }
  0x73   :  { %1033 = vmatprep.subr.bf16.mxu0 %v1768_v32  ;;  %v1838_v32 = vld [vmem:[#allocation10 + $0x3f0] ss:$8 sps:$4 sm:$0xff]  }
  0x75   :  { %948 = vmatpush1.bf16.msra.mxu1 %v1763_v33  ;;  %v76_v33 = vld [vmem:[#allocation7 + $0x10] sm:$0xff] }
  0x76   :  { %1034 = vmatpush1.bf16.msra.mxu0 %v1766_v34  ;;  %949 = vmatprep.subr.bf16.mxu1 %v1771_v35  ;;  %v84_v34 = vld [vmem:[#allocation7 + $0x50] sm:$0xff] }
  0x77   :  { %1035 = vmatprep.subr.bf16.mxu0 %v1774_v36  ;;  %v80_v35 = vld [vmem:[#allocation7 + $0x30] sm:$0xff] }
  0x78   :  { %v88_v36 = vld [vmem:[#allocation7 + $0x70] sm:$0xff] }
  0x79   :  { %950 = vmatpush1.bf16.msra.mxu1 %v1769_v37  ;;  %v2056_v37 = vpack.c.bf16 %v84_v34, %v76_v33 }
  0x7a   :  { %1036 = vmatpush1.bf16.msra.mxu0 %v1772_v39  ;;  %951 = vmatprep.subr.bf16.mxu1 %v1777_v40  ;;  %v2058_v39 = vpack.c.bf16 %v88_v36, %v80_v35 }
  0x7b   :  { %1037 = vmatprep.subr.bf16.mxu0 %v1780_v41 }
  0x7d   :  { %952 = vmatpush1.bf16.msra.mxu1 %v1775_v42 }
  0x7e   :  { %1038 = vmatpush1.bf16.msra.mxu0 %v1778_v43  ;;  %953 = vmatprep.subr.bf16.mxu1 %v1783_v44 }
  0x7f   :  { %1039 = vmatprep.subr.bf16.mxu0 %v1786_v45 }
  0x81   :  { %954 = vmatpush1.bf16.msra.mxu1 %v1781_v46 }
  0x82   :  { %1040 = vmatpush1.bf16.msra.mxu0 %v1784_v47  ;;  %955 = vmatprep.subr.bf16.mxu1 %v1789_v48 }
  0x83   :  { %1041 = vmatprep.subr.bf16.mxu0 %v1792_v53 }
  0x85   :  { %956 = vmatpush1.bf16.msra.mxu1 %v1787_v60 }
  0x86   :  { %1042 = vmatpush1.bf16.msra.mxu0 %v1790_v61  ;;  %957 = vmatprep.subr.bf16.mxu1 %v1795_v63 }
  0x87   :  { %1043 = vmatprep.subr.bf16.mxu0 %v1798_v0 }
  0x89   :  { %958 = vmatpush1.bf16.msra.mxu1 %v1793_v1 }
  0x8a   :  { %1044 = vmatpush1.bf16.msra.mxu0 %v1796_v2  ;;  %959 = vmatprep.subr.bf16.mxu1 %v1801_v3 }
  0x8b   :  { %1045 = vmatprep.subr.bf16.mxu0 %v1804_v4 }
  0x8d   :  { %960 = vmatpush1.bf16.msra.mxu1 %v1799_v5 }
  0x8e   :  { %1046 = vmatpush1.bf16.msra.mxu0 %v1802_v6  ;;  %961 = vmatprep.subr.bf16.mxu1 %v1807_v7  ;;  %v1591_v6 = vld [vmem:[%s2143_s5] ss:$0 sm:$0xff] }
  0x8f   :  { %1047 = vmatprep.subr.bf16.mxu0 %v1810_v8 }
  0x91   :  { %962 = vmatpush1.bf16.msra.mxu1 %v1805_v9 }
  0x92   :  { %1048 = vmatpush1.bf16.msra.mxu0 %v1808_v10  ;;  %963 = vmatprep.subr.bf16.mxu1 %v1813_v11 }
  0x93   :  { %1049 = vmatprep.subr.bf16.mxu0 %v1816_v12 }
  0x95   :  { %964 = vmatpush1.bf16.msra.mxu1 %v1811_v13  ;;  %v1939_v13 = vmov -1e+30  }
  0x96   :  { %1050 = vmatpush1.bf16.msra.mxu0 %v1814_v14  ;;  %965 = vmatprep.subr.bf16.mxu1 %v1819_v15  ;;  %60 = vst.msk [vmem:[#allocation2] sm:$0x1] %vm59_vm3, %v1939_v13  ;;  %v1940_v14 = vmov 0   ;;  %v1941_v15 = vmov 0.0  }
  0x97   :  { %1051 = vmatprep.subr.bf16.mxu0 %v1822_v16  ;;  %1648 = vset.pattern.permute.xlu0 %v1940_v14  ;;  %61 = vst.msk [vmem:[#allocation3] sm:$0x1] %vm59_vm3, %v1941_v15  ;;  %v1100_v16 = vstv %s2139_s1  ;;  %s1943_s1 = smov [#allocation12]  }
  0x98   :  { %s1427_s28 = sshll.u32 %s1943_s1, 4  ;;  %s1428_s28 = int_to_ptr.vmem [resolvable:$true] %s1427_s28 }
  0x99   :  { %966 = vmatpush1.bf16.msra.mxu1 %v1817_v17  ;;  %s1905_s29 = scalar_lea.vmem %s1428_s28, 128  ;;  %p1910_p3 = scmp.lt.s32.totalorder %s1428_s28, %s1428_s28 }
  0x9a   :  { %1052 = vmatpush1.bf16.msra.mxu0 %v1820_v18  ;;  %967 = vmatprep.subr.bf16.mxu1 %v1825_v19  ;;  %p1906_p2 = scmp.ne.s32.totalorder %s1428_s28, %s1905_s29  ;;  %p1911_p4 = scmp.lt.s32.totalorder %s1905_s29, %s1905_s29 }
  0x9b   :  { %1053 = vmatprep.subr.bf16.mxu0 %v1828_v22 }
  0x9c   :  { %p1912_p5 = por %p1911_p4, %p1910_p3 }
  0x9d   :  { %968 = vmatpush1.bf16.msra.mxu1 %v1823_v23 }
  0x9e   :  { %1054 = vmatpush1.bf16.msra.mxu0 %v1826_v24  ;;  %969 = vmatprep.subr.bf16.mxu1 %v1831_v25  ;;  %p1913_p6 = pnand %p1912_p5, %p1906_p2 }
  0x9f   :  { %1055 = vmatprep.subr.bf16.mxu0 %v1834_v26 }
  0xa1   :  { %970 = vmatpush1.bf16.msra.mxu1 %v1829_v27 }
  0xa2   :  { %1056 = vmatpush1.bf16.msra.mxu0 %v1832_v28  ;;  %971 = vmatprep.subr.bf16.mxu1 %v1837_v29 }
  0xa3   :  { %1057 = vmatprep.subr.bf16.mxu0 %v1840_v30 }
  0xa5   :  { %972 = vmatpush1.bf16.msra.mxu1 %v1835_v31  ;;  %v1105_v31 = vld [vmem:[#allocation2] sm:$0x1] }
  0xa6   :  { %1058 = vmatpush1.bf16.msra.mxu0 %v1838_v32  ;;  %1608 = vmatprep.subr.msk.bf16.mxu1 %vm2022_vm2, %v2031_v62  ;;  %v246_v62 = vld [vmem:[%s2142_s4] sm:$0x3] }
  0xa7   :  { %1594 = vmatprep.subr.msk.bf16.mxu0 %vm2022_vm2, %v2026_v59  ;;  %v2085_v59 = vsub.s32 0, %v2003_v38 }
  0xa8   :  { %1576 = vmatmul.mubr.msk.bf16.vlgmr.msra.gmra.mrb[0].mxu1 %vm2022_vm2, %v2056_v37 }
  0xa9   :  { %1588 = vmatmul.mubr.msk.bf16.vlgmr.msra.gmra.mrb[0].mxu0 %vm2022_vm2, %v2058_v39  ;;  %1611 = vmatpush1.bf16.msk.msra.mxu1 %vm2022_vm2, %v2038_v21  ;;  %v251_v40 = vrot.slane %v246_v62, %v2085_v59 }
  0xaa   :  { %1597 = vmatpush1.bf16.msk.msra.mxu0 %vm2022_vm2, %v2036_v20  ;;  %1615 = vmatprep.subr.msk.bf16.mxu1 %vm2022_vm2, %v2048_v58  ;;  %v254_v20 = vsub.s32 1, %v2003_v38 }
  0xab   :  { %1601 = vmatprep.subr.msk.bf16.mxu0 %vm2022_vm2, %v2046_v54  ;;  %1210 = vmatprep.mubr.bf16.mxu0 %v1940_v14 }
  0xac   :  { %v255_v21 = vrot.slane %v246_v62, %v254_v20  ;;  %1292 = vmatprep.mubr.bf16.mxu1 %v1940_v14 }
 0x17b   :  { %v975_v41 = vpop.f32.mrb[0].mxu1 }
 0x17c   :  { %v1061_v42 = vpop.f32.mrb[0].mxu0  ;;  %v1620_v43 = vadd.f32 %v975_v41, %v251_v40  ;;  %v977_v44 = vpop.f32.mrb[1].mxu1 }
 0x17d   :  { %v1063_v45 = vpop.f32.mrb[1].mxu0  ;;  %v1622_v46 = vadd.f32 %v977_v44, %v255_v21  ;;  %v979_v47 = vpop.f32.mrb[2].mxu1 }
 0x17e   :  { %v1065_v48 = vpop.f32.mrb[2].mxu0  ;;  %v1621_v51 = vadd.f32 %v1620_v43, %v1061_v42  ;;  %v1624_v52 = vadd.f32 %v979_v47, %v251_v40  ;;  %v981_v53 = vpop.f32.mrb[3].mxu1 }
 0x17f   :  { %v1067_v54 = vpop.f32.mrb[3].mxu0  ;;  %v1623_v55 = vadd.f32 %v1622_v46, %v1063_v45  ;;  %v1626_v57 = vadd.f32 %v981_v53, %v255_v21 }
 0x180   :  { %v1625_v58 = vadd.f32 %v1624_v52, %v1065_v48 }
 0x181   :  { %v1589_v60 = vmul.f32 -1.442695, %v1623_v55  ;;  %v1627_v61 = vadd.f32 %v1626_v57, %v1067_v54  ;;  %v1131_v57 = vld [vmem:[#allocation3] sm:$0x1] }
 0x183   :  { %1841 = vpow2.f32 %v1589_v60  ;;  %v1590_v63 = vmul.f32 -1.442695, %v1627_v61 }
 0x185   :  { %1843 = vpow2.f32 %v1590_v63 }
 0x186   :  { %1845 = vtanh.f32 %v1621_v51 }
 0x18d   :  { %v1842_v0 = vpop.eup %1841 }
 0x18e   :  { %v1078_v1 = vadd.f32 1.0, %v1842_v0 }
 0x18f   :  { %v1844_v2 = vpop.eup %1843 }
 0x190   :  { %1847 = vrcp.f32 %v1078_v1  ;;  %v1079_v3 = vadd.f32 1.0, %v1844_v2  ;;  %v1846_v4 = vpop.eup %1845 }
 0x191   :  { %1849 = vtanh.f32 %v1625_v58 }
 0x192   :  { %1851 = vrcp.f32 %v1079_v3  ;;  %v1942_v3 = vmov 1966171168  }
 0x19a   :  { %v1848_v5 = vpop.eup %1847 }
 0x19b   :  { %v1850_v7 = vpop.eup %1849  ;;  %v1084_v8 = vmul.f32 %v1848_v5, %v1846_v4  ;;  %v1355_v4 = vunpack.c.l.s4 %v1942_v3 }
 0x19c   :  { %v1852_v9 = vpop.eup %1851 }
 0x19d   :  { %v1093_v10 = vmul.f32 %v1591_v6, %v1084_v8  ;;  %v1085_v11 = vmul.f32 %v1852_v9, %v1850_v7 }
 0x19f   :  { %1095 = vadd.xlane.f32.xlu0 %v1093_v10  ;;  %v1094_v12 = vmul.f32 %v1591_v6, %v1085_v11 }
 0x1a3   :  { %1097 = vadd.xlane.f32.xlu0 %v1094_v12 }
 0x22c   :  { %v1096_v17 = vpop.xlane.xlu0 %1095 }
 0x22d   :  { %v1101_v18 = vadd.f32 %v1100_v16, %v1096_v17 }
 0x22f   :  { %v1103_v23 = vsel %vm2010_vm0, %v1101_v18, -1e+30 }
 0x230   :  { %v1098_v19 = vpop.xlane.xlu0 %1097 }
 0x231   :  { %v1102_v22 = vadd.f32 %v1100_v16, %v1098_v19 }
 0x233   :  { %v1104_v24 = vsel %vm2014_vm1, %v1102_v22, -1e+30 }
 0x234   :  { %v1106_v25 = vmax.f32 %v1103_v23, %v1104_v24 }
 0x236   :  { %v1107_v26 = vrot.slane %v1106_v25, 4 }
 0x238   :  { %v1108_v27 = vmax.f32 %v1106_v25, %v1107_v26 }
 0x23a   :  { %v1109_v28 = vrot.slane %v1108_v27, 2 }
 0x23c   :  { %v1110_v29 = vmax.f32 %v1108_v27, %v1109_v28 }
 0x23e   :  { %v1111_v30 = vrot.slane %v1110_v29, 1 }
 0x240   :  { %v1112_v32 = vmax.f32 %v1110_v29, %v1111_v30 }
 0x242   :  { %v1113_v33 = vmax.f32 %v1105_v31, %v1112_v32 }
 0x244   :  { %v1114_v34 = vsub.f32 %v1105_v31, %v1113_v33  ;;  %v1121_v35 = vrot.slane %v1113_v33, %v2085_v59  ;;  %1402 = vst.msk [vmem:[#allocation2] sm:$0x1] %vm59_vm3, %v1113_v33 }
 0x246   :  { %v1115_v36 = vmul.f32 1.442695, %v1114_v34  ;;  %v1123_v62 = vsub.f32 %v1103_v23, %v1121_v35  ;;  %v1124_v20 = vsub.f32 %v1104_v24, %v1121_v35 }
 0x248   :  { %1853 = vpow2.f32 %v1115_v36  ;;  %v1125_v40 = vmul.f32 1.442695, %v1123_v62  ;;  %v1127_v21 = vmul.f32 1.442695, %v1124_v20 }
 0x24a   :  { %1855 = vpow2.f32 %v1125_v40 }
 0x24b   :  { %1857 = vpow2.f32 %v1127_v21 }
 0x252   :  { %v1854_v41 = vpop.eup %1853 }
 0x253   :  { %1149 = vperm.xlu0 %1648, %v1854_v41   ;;  %v1132_v60 = vmul.f32 %v1854_v41, %v1131_v57 }
 0x254   :  { %v1856_v42 = vpop.eup %1855 }
 0x255   :  { %v1858_v43 = vpop.eup %1857  ;;  %v1129_v44 = vsel %vm2010_vm0, %v1856_v42, 0.0 }
 0x256   :  { %v1130_v45 = vsel %vm2014_vm1, %v1858_v43, 0.0  ;;  %v1134_v46 = vsel %vm1133_vm4, %v1129_v44, 0.0 }
 0x257   :  { %v1135_v47 = vsel %vm1133_vm4, %v1130_v45, 0.0  ;;  %v1157_v48 = vpack.c.bf16 %v1130_v45, %v1129_v44 }
 0x258   :  { %v1136_v51 = vadd.f32 %v1135_v47, %v1134_v46 }
 0x259   :  { %1158 = vxpose.xlu1.c.b16.start.end [1/1] (short) (narrow) %v1157_v48, 16 }
 0x25a   :  { %v1137_v52 = vrot.slane %v1136_v51, 4 }
 0x25c   :  { %v1138_v53 = vadd.f32 %v1137_v52, %v1136_v51 }
 0x25d   :  { %1647 = vset.pattern.permute.xlu1 %v1940_v14 }
 0x25e   :  { %v1139_v54 = vrot.slane %v1138_v53, 2 }
 0x260   :  { %v1140_v55 = vadd.f32 %v1139_v54, %v1138_v53 }
 0x262   :  { %v1141_v58 = vrot.slane %v1140_v55, 1 }
 0x264   :  { %v1142_v61 = vadd.f32 %v1141_v58, %v1140_v55 }
 0x266   :  { %v1143_v49 = vadd.f32 %v1142_v61, %v1132_v60 }
 0x268   :  { %1145 = vst.msk [vmem:[#allocation3] sm:$0x1] %vm59_vm3, %v1143_v49 }
 0x26f   :  { %v1406_v50 = vld [vmem:[#allocation3] sm:$0x1] }
 0x270   :  { %v1407_v63 = vmax.f32 %v1406_v50, 1e-30 }
 0x272   :  { %1411 = vperm.xlu1 %1647, %v1407_v63  }
 0x2bf   :  { %v1166_v0 = vpop.trf.xlu1 }
 0x2c0   :  { %1598 = vmatmul.mubr.msk.bf16.vlgmr.msra.gmra.mrb[4].mxu0 %vm1174_vm5, %v1166_v0  ;;  %1612 = vmatmul.mubr.msk.bf16.vlgmr.msra.gmra.mrb[4].mxu1 %vm1174_vm5, %v1166_v0 }
 0x2c1   :  { %1604 = vmatpush1.bf16.msk.msra.mxu0 %vm2022_vm2, %v2056_v37  ;;  %1618 = vmatpush1.bf16.msk.msra.mxu1 %vm2022_vm2, %v2058_v39  ;;  %v1356_v39 = vunpack.c.0.s8 %v1355_v4 }
 0x2c2   :  { %1251 = vmatprep.mubr.bf16.mxu0 %v1940_v14  ;;  %1333 = vmatprep.mubr.bf16.mxu1 %v1940_v14 }
 0x2c3   :  { %v1359_v14 = vsub.s32 %v1356_v39, %v2003_v38 }
 0x2c8   :  { %1605 = vmatmul.mubr.msk.bf16.vlgmr.msra.gmra.mrb[8].mxu0 %vm1174_vm5, %v1166_v0  ;;  %1619 = vmatmul.mubr.msk.bf16.vlgmr.msra.gmra.mrb[8].mxu1 %vm1174_vm5, %v1166_v0 }
 0x2d2   :  { %v1150_v12 = vpop.permute.xlu0 %1149 }
 0x2d3   :  { %v1155_v31 = vrot.slane %v1150_v12, %v2085_v59 }
 0x2d5   :  { %v1156_v35 = vmul.f32 0.0, %v1155_v31 }
 0x2f1   :  { %v1412_v56 = vpop.permute.xlu1 %1411 }
 0x2f2   :  { %v1417_v13 = vrot.slane %v1412_v56, %v2085_v59 }
 0x2f4   :  { %1859 = vrcp.f32 %v1417_v13 }
 0x2fe   :  { %v1860_v20 = vpop.eup %1859 }
 0x393   :  { %v1212_v1 = vpop.f32.mrb[4].mxu0  ;;  %v1294_v2 = vpop.f32.mrb[4].mxu1 }
 0x394   :  { %v1214_v5 = vpop.f32.mrb[5].mxu0  ;;  %v1296_v6 = vpop.f32.mrb[5].mxu1 }
 0x395   :  { %v1350_v7 = vcombine.low %v1212_v1, %v1214_v5  ;;  %v1352_v8 = vcombine.low %v1294_v2, %v1296_v6  ;;  %v1216_v9 = vpop.f32.mrb[6].mxu0  ;;  %v1298_v37 = vpop.f32.mrb[6].mxu1 }
 0x396   :  { %v1217_v10 = vpop.f32.mrb[7].mxu0  ;;  %v1299_v11 = vpop.f32.mrb[7].mxu1 }
 0x397   :  { %v1360_v27 = vrot.slane %v1350_v7, %v1359_v14  ;;  %v1374_v28 = vrot.slane %v1352_v8, %v1359_v14 }
 0x39b   :  { %v1253_v15 = vpop.f32.mrb[8].mxu0  ;;  %v1335_v16 = vpop.f32.mrb[8].mxu1 }
 0x39c   :  { %v1255_v17 = vpop.f32.mrb[9].mxu0  ;;  %v1337_v18 = vpop.f32.mrb[9].mxu1 }
 0x39d   :  { %v1351_v19 = vcombine.low %v1253_v15, %v1255_v17  ;;  %v1353_v22 = vcombine.low %v1335_v16, %v1337_v18  ;;  %v1257_v23 = vpop.f32.mrb[10].mxu0  ;;  %v1339_v24 = vpop.f32.mrb[10].mxu1 }
 0x39e   :  { %v1258_v25 = vpop.f32.mrb[11].mxu0  ;;  %v1340_v26 = vpop.f32.mrb[11].mxu1 }
 0x39f   :  { %v1367_v29 = vrot.slane %v1351_v19, %v1359_v14  ;;  %v1381_v30 = vrot.slane %v1353_v22, %v1359_v14 }
 0x3a1   :  { %v1382_v32 = vcombine.low %v1360_v27, %v1367_v29  ;;  %v1383_v33 = vcombine.low %v1374_v28, %v1381_v30 }
 0x3a3   :  { %v1390_v38 = vrot.slane %v1382_v32, %v1359_v14  ;;  %v1397_v34 = vrot.slane %v1383_v33, %v1359_v14 }
 0x3a5   :  { %v1398_v36 = vcombine.low %v1390_v38, %v1397_v34 }
 0x3a7   :  { %v1400_v62 = vadd.f32 %v1398_v36, %v1156_v35 }
 0x3a9   :  { %v1419_v40 = vmul.f32 %v1860_v20, %v1400_v62 }
 0x3ab   :  { %1420 = vst [vmem:[#allocation12] sm:$0xff] %v1419_v40 }
 0x3ac   :  { %1916 = shalt.err (!%p1913_p6)
}
 0x3ad   :  { %s1917_s8 = scalar_lea.hbm %s2144_s6, 128 }
 0x3ae   :  { %p1918_p7 = scmp.ne.s32.totalorder %s2144_s6, %s1917_s8  ;;  %p1921_p8 = scmp.lt.u32.totalorder %s1917_s8, %s2144_s6 }
 0x3b0   :  { %p1923_p9 = pnand %p1921_p8, %p1918_p7 }
 0x3b2   :  { %1926 = shalt.err (!%p1923_p9)
}
 0x3b3   :  { %1430 = dma.vmem_to_hbm [thread:$0]  %s1428_s28, 128, %s2144_s6, [#allocation9]  }
 0x3b4   :  { %1931 = dma.done.wait [#allocation9], 128  }
 0x3b5   :  { %1932 = vsyncadd [#allocation9], 4294967168 }
 0x3b6   :  { %1434 = vsyncpa [#allocation8], 1 }
 0x3b7   :  { %1435 = vsyncpa [#allocation11], 1 }
 0x3b8   :  { %1436 = vsyncpa [#allocation9], 1 }

</bundles_post_ra>
